<compile_context>
chip_gen: v6e
topology: v6e:2x2x1
jax: 0.10.0
libtpu: 0.0.40
codegen_flags: <defaults>
</compile_context>

<pallas_src>
import jax
import jax.numpy as jnp
from jax.experimental import pallas as pl
from jax.experimental.pallas import tpu as pltpu

SIGMA_DATA = 0.5  # module default sigma_data
TB = 8            # batch tile = f32 sublane count


def edm_precond_kernel(x_ref, sigma_ref, invfreq_ref,
                       w1_ref, wts_ref, wtc_ref, b1_ref, w2_ref, b2_ref,
                       out_ref):
    x = x_ref[...]                                   # (TB, L) f32, dense tile
    sigma = sigma_ref[...]                           # (TB, 1) f32

    sd2 = SIGMA_DATA * SIGMA_DATA
    r = jax.lax.rsqrt(sigma * sigma + sd2)           # one EUP rsqrt
    c_in = r                                         # 1/sqrt(s^2+sd^2)
    c_out = sigma * SIGMA_DATA * r                   # s*sd/sqrt(s^2+sd^2)
    c_skip = sd2 * (r * r)                           # sd^2/(s^2+sd^2)
    c_noise = jnp.log(sigma) * 0.25                  # log(s)/4

    # ---- inner model F(c_in * x, c_noise) ---------------------------------
    h = c_in * x                                     # (TB, L)

    # sinusoidal time embedding of c_noise; weight pre-split -> no lane concat
    args = c_noise * invfreq_ref[...]                # (TB,1)*(1,T/2) -> (TB, T/2)
    sin_e = jnp.sin(args)
    cos_e = jnp.cos(args)

    h1 = (jnp.dot(h, w1_ref[...], preferred_element_type=jnp.float32)
          + jnp.dot(sin_e, wts_ref[...], preferred_element_type=jnp.float32)
          + jnp.dot(cos_e, wtc_ref[...], preferred_element_type=jnp.float32)
          + b1_ref[...])                             # (TB, H)
    h1 = h1 * (1.0 / (1.0 + jnp.exp(-h1)))           # SiLU (exp on EUP)
    f = (jnp.dot(h1, w2_ref[...], preferred_element_type=jnp.float32)
         + b2_ref[...])                              # (TB, L)
    # -----------------------------------------------------------------------

    out_ref[...] = c_skip * x + c_out * f            # D_x, dense unmasked store


def edm_precond(x, sigma, inv_freq, w1, wt, b1, w2, b2):
    """x: (B, C, L) f32, sigma: (B,) f32. Returns D_x: (B, C, L) f32."""
    B, C, L = x.shape
    assert C == 1, "surrogate inner model operates on single-channel (B, 1, L) data"
    T2 = inv_freq.shape[-1]            # TIME_DIM // 2
    HID = w1.shape[1]

    # layout plumbing in the wrapper (free XLA reshapes / host-side slices)
    x2d = x.astype(jnp.float32).reshape(B, L)
    sigma2d = sigma.astype(jnp.float32).reshape(B, 1)
    wt_sin = wt[:T2]                   # (T/2, H)
    wt_cos = wt[T2:]                   # (T/2, H)

    # pad batch to the f32 sublane multiple; pad sigma with 1.0 so padded rows
    # stay finite (they are discarded after the call)
    B_pad = ((B + TB - 1) // TB) * TB
    if B_pad != B:
        x2d = jnp.pad(x2d, ((0, B_pad - B), (0, 0)))
        sigma2d = jnp.pad(sigma2d, ((0, B_pad - B), (0, 0)), constant_values=1.0)

    out = pl.pallas_call(
        edm_precond_kernel,
        out_shape=jax.ShapeDtypeStruct((B_pad, L), jnp.float32),
        grid=(B_pad // TB,),
        in_specs=[
            pl.BlockSpec((TB, L), lambda i: (i, 0)),      # x tile
            pl.BlockSpec((TB, 1), lambda i: (i, 0)),      # sigma tile
            pl.BlockSpec((1, T2), lambda i: (0, 0)),      # inv_freq (resident)
            pl.BlockSpec((L, HID), lambda i: (0, 0)),     # w1       (resident)
            pl.BlockSpec((T2, HID), lambda i: (0, 0)),    # wt_sin   (resident)
            pl.BlockSpec((T2, HID), lambda i: (0, 0)),    # wt_cos   (resident)
            pl.BlockSpec((1, HID), lambda i: (0, 0)),     # b1       (resident)
            pl.BlockSpec((HID, L), lambda i: (0, 0)),     # w2       (resident)
            pl.BlockSpec((1, L), lambda i: (0, 0)),       # b2       (resident)
        ],
        out_specs=pl.BlockSpec((TB, L), lambda i: (i, 0)),
        compiler_params=pltpu.CompilerParams(
            dimension_semantics=("parallel",)),           # shards batch on v7x's 2 TCs
    )(x2d, sigma2d, inv_freq, w1, wt_sin, wt_cos, b1, w2, b2)

    return out[:B].reshape(B, C, L)


def edm_precond_ref(x, sigma, inv_freq, w1, wt, b1, w2, b2):
    """Pure-JAX reference of the module's math (for correctness check)."""
    x = x.astype(jnp.float32)
    sigma = sigma.astype(jnp.float32).reshape(-1, 1, 1)
    sd2 = SIGMA_DATA * SIGMA_DATA
    c_skip = sd2 / (sigma ** 2 + sd2)
    c_out = sigma * SIGMA_DATA / jnp.sqrt(sigma ** 2 + sd2)
    c_in = 1.0 / jnp.sqrt(sd2 + sigma ** 2)
    c_noise = jnp.log(sigma) / 4.0

    h = (c_in * x)[:, 0, :]
    args = c_noise.reshape(-1, 1) * inv_freq
    temb = jnp.concatenate([jnp.sin(args), jnp.cos(args)], axis=-1)
    h1 = h @ w1 + temb @ wt + b1
    h1 = h1 * jax.nn.sigmoid(h1)
    f = h1 @ w2 + b2
    F_x = f[:, None, :]
    return c_skip * x + c_out * F_x


if __name__ == "__main__":
    B, C, L = 2, 1, 128          # batch, channels, resolution
    TIME_DIM, HID = 256, 128     # time_dim=256 per module; surrogate hidden=128

    key = jax.random.PRNGKey(0)
    k = jax.random.split(key, 6)
    x = jax.random.normal(k[0], (B, C, L), jnp.float32)
    sigma = jax.random.uniform(k[1], (B,), jnp.float32, minval=0.1, maxval=2.0)

    # deterministic synthetic parameters for the surrogate inner model
    w1 = jax.random.normal(k[2], (L, HID), jnp.float32) * 0.05
    wt = jax.random.normal(k[3], (TIME_DIM, HID), jnp.float32) * 0.05
    b1 = jnp.zeros((1, HID), jnp.float32)
    w2 = jax.random.normal(k[4], (HID, L), jnp.float32) * 0.05
    b2 = jnp.zeros((1, L), jnp.float32)
    inv_freq = (1.0 / (10000.0 ** (jnp.arange(0, TIME_DIM, 2, dtype=jnp.float32)
                                   / TIME_DIM)))[None, :]   # (1, TIME_DIM//2)

    d_x = edm_precond(x, sigma, inv_freq, w1, wt, b1, w2, b2)
    jax.block_until_ready(d_x)

    ref = edm_precond_ref(x, sigma, inv_freq, w1, wt, b1, w2, b2)
    assert d_x.shape == (B, C, L) and d_x.dtype == jnp.float32
    assert jnp.allclose(d_x, ref, atol=1e-5, rtol=1e-5), "mismatch vs reference"
    print("KERNEL_OK")
</pallas_src>

<mosaic_0001>
module attributes {stable_mosaic.version = 11 : i64} {
  func.func @edm_precond_kernel(%arg0: i32, %arg1: memref<8x128xf32, #tpu.memory_space<vmem>>, %arg2: memref<8x1xf32, #tpu.memory_space<vmem>>, %arg3: memref<1x128xf32, #tpu.memory_space<vmem>>, %arg4: memref<128x128xf32, #tpu.memory_space<vmem>>, %arg5: memref<128x128xf32, #tpu.memory_space<vmem>>, %arg6: memref<128x128xf32, #tpu.memory_space<vmem>>, %arg7: memref<1x128xf32, #tpu.memory_space<vmem>>, %arg8: memref<128x128xf32, #tpu.memory_space<vmem>>, %arg9: memref<1x128xf32, #tpu.memory_space<vmem>>, %arg10: memref<8x128xf32, #tpu.memory_space<vmem>>) attributes {dimension_semantics = [#tpu.dimension_semantics<parallel>], iteration_bounds = array<i64: 1>, scalar_prefetch = 0 : i64, scratch_operands = 0 : i64, tpu.core_type = #tpu.core_type<tc>, window_params = [{transform_indices = @transform_0, window_bounds = array<i64: 8, 128>}, {transform_indices = @transform_1, window_bounds = array<i64: 8, 1>}, {pipeline_mode = #tpu.pipeline_mode<synchronous>, transform_indices = @transform_2, window_bounds = array<i64: 1, 128>}, {pipeline_mode = #tpu.pipeline_mode<synchronous>, transform_indices = @transform_3, window_bounds = array<i64: 128, 128>}, {pipeline_mode = #tpu.pipeline_mode<synchronous>, transform_indices = @transform_4, window_bounds = array<i64: 128, 128>}, {pipeline_mode = #tpu.pipeline_mode<synchronous>, transform_indices = @transform_5, window_bounds = array<i64: 128, 128>}, {pipeline_mode = #tpu.pipeline_mode<synchronous>, transform_indices = @transform_6, window_bounds = array<i64: 1, 128>}, {pipeline_mode = #tpu.pipeline_mode<synchronous>, transform_indices = @transform_7, window_bounds = array<i64: 128, 128>}, {pipeline_mode = #tpu.pipeline_mode<synchronous>, transform_indices = @transform_8, window_bounds = array<i64: 1, 128>}, {transform_indices = @transform_9, window_bounds = array<i64: 8, 128>}]} {
    %c0 = arith.constant 0 : index
    %c0_0 = arith.constant 0 : index
    %0 = vector.load %arg1[%c0, %c0_0] : memref<8x128xf32, #tpu.memory_space<vmem>>, vector<8x128xf32>
    %c0_1 = arith.constant 0 : index
    %c0_2 = arith.constant 0 : index
    %1 = vector.load %arg2[%c0_1, %c0_2] : memref<8x1xf32, #tpu.memory_space<vmem>>, vector<8x1xf32>
    %2 = arith.mulf %1, %1 : vector<8x1xf32>
    %cst = arith.constant 2.500000e-01 : f32
    %3 = vector.broadcast %cst : f32 to vector<8x1xf32>
    %4 = arith.addf %2, %3 : vector<8x1xf32>
    %5 = math.rsqrt %4 : vector<8x1xf32>
    %cst_3 = arith.constant 5.000000e-01 : f32
    %6 = vector.broadcast %cst_3 : f32 to vector<8x1xf32>
    %7 = arith.mulf %1, %6 : vector<8x1xf32>
    %8 = arith.mulf %7, %5 : vector<8x1xf32>
    %9 = arith.mulf %5, %5 : vector<8x1xf32>
    %cst_4 = arith.constant 2.500000e-01 : f32
    %10 = vector.broadcast %cst_4 : f32 to vector<8x1xf32>
    %11 = arith.mulf %10, %9 : vector<8x1xf32>
    %12 = math.log %1 : vector<8x1xf32>
    %cst_5 = arith.constant 2.500000e-01 : f32
    %13 = vector.broadcast %cst_5 : f32 to vector<8x1xf32>
    %14 = arith.mulf %12, %13 : vector<8x1xf32>
    %15 = vector.broadcast %5 : vector<8x1xf32> to vector<8x128xf32>
    %16 = arith.mulf %15, %0 : vector<8x128xf32>
    %c0_6 = arith.constant 0 : index
    %c0_7 = arith.constant 0 : index
    %17 = vector.load %arg3[%c0_6, %c0_7] : memref<1x128xf32, #tpu.memory_space<vmem>>, vector<1x128xf32>
    %18 = vector.broadcast %14 : vector<8x1xf32> to vector<8x128xf32>
    %19 = vector.broadcast %17 : vector<1x128xf32> to vector<8x128xf32>
    %20 = arith.mulf %18, %19 : vector<8x128xf32>
    %21 = math.sin %20 : vector<8x128xf32>
    %22 = math.cos %20 : vector<8x128xf32>
    %c0_8 = arith.constant 0 : index
    %c0_9 = arith.constant 0 : index
    %23 = vector.load %arg4[%c0_8, %c0_9] : memref<128x128xf32, #tpu.memory_space<vmem>>, vector<128x128xf32>
    %cst_10 = arith.constant dense<0.000000e+00> : vector<8x128xf32>
    %24 = tpu.matmul %16, %23, %cst_10 {dimension_numbers = #tpu.dot_dimension_numbers<[1], [0], [0], [1], [0, 0, 1, 1], [], []>} : vector<8x128xf32>, vector<128x128xf32>, vector<8x128xf32> -> vector<8x128xf32>
    %c0_11 = arith.constant 0 : index
    %c0_12 = arith.constant 0 : index
    %25 = vector.load %arg5[%c0_11, %c0_12] : memref<128x128xf32, #tpu.memory_space<vmem>>, vector<128x128xf32>
    %cst_13 = arith.constant dense<0.000000e+00> : vector<8x128xf32>
    %26 = tpu.matmul %21, %25, %cst_13 {dimension_numbers = #tpu.dot_dimension_numbers<[1], [0], [0], [1], [0, 0, 1, 1], [], []>} : vector<8x128xf32>, vector<128x128xf32>, vector<8x128xf32> -> vector<8x128xf32>
    %27 = arith.addf %24, %26 : vector<8x128xf32>
    %c0_14 = arith.constant 0 : index
    %c0_15 = arith.constant 0 : index
    %28 = vector.load %arg6[%c0_14, %c0_15] : memref<128x128xf32, #tpu.memory_space<vmem>>, vector<128x128xf32>
    %cst_16 = arith.constant dense<0.000000e+00> : vector<8x128xf32>
    %29 = tpu.matmul %22, %28, %cst_16 {dimension_numbers = #tpu.dot_dimension_numbers<[1], [0], [0], [1], [0, 0, 1, 1], [], []>} : vector<8x128xf32>, vector<128x128xf32>, vector<8x128xf32> -> vector<8x128xf32>
    %30 = arith.addf %27, %29 : vector<8x128xf32>
    %c0_17 = arith.constant 0 : index
    %c0_18 = arith.constant 0 : index
    %31 = vector.load %arg7[%c0_17, %c0_18] : memref<1x128xf32, #tpu.memory_space<vmem>>, vector<1x128xf32>
    %32 = vector.broadcast %31 : vector<1x128xf32> to vector<8x128xf32>
    %33 = arith.addf %30, %32 : vector<8x128xf32>
    %cst_19 = arith.constant 0.000000e+00 : f32
    %34 = vector.broadcast %cst_19 : f32 to vector<8x128xf32>
    %35 = arith.subf %34, %33 : vector<8x128xf32>
    %36 = math.exp %35 : vector<8x128xf32>
    %cst_20 = arith.constant 1.000000e+00 : f32
    %37 = vector.broadcast %cst_20 : f32 to vector<8x128xf32>
    %38 = arith.addf %37, %36 : vector<8x128xf32>
    %cst_21 = arith.constant 1.000000e+00 : f32
    %39 = vector.broadcast %cst_21 : f32 to vector<8x128xf32>
    %40 = arith.divf %39, %38 : vector<8x128xf32>
    %41 = arith.mulf %33, %40 : vector<8x128xf32>
    %c0_22 = arith.constant 0 : index
    %c0_23 = arith.constant 0 : index
    %42 = vector.load %arg8[%c0_22, %c0_23] : memref<128x128xf32, #tpu.memory_space<vmem>>, vector<128x128xf32>
    %cst_24 = arith.constant dense<0.000000e+00> : vector<8x128xf32>
    %43 = tpu.matmul %41, %42, %cst_24 {dimension_numbers = #tpu.dot_dimension_numbers<[1], [0], [0], [1], [0, 0, 1, 1], [], []>} : vector<8x128xf32>, vector<128x128xf32>, vector<8x128xf32> -> vector<8x128xf32>
    %c0_25 = arith.constant 0 : index
    %c0_26 = arith.constant 0 : index
    %44 = vector.load %arg9[%c0_25, %c0_26] : memref<1x128xf32, #tpu.memory_space<vmem>>, vector<1x128xf32>
    %45 = vector.broadcast %44 : vector<1x128xf32> to vector<8x128xf32>
    %46 = arith.addf %43, %45 : vector<8x128xf32>
    %47 = vector.broadcast %11 : vector<8x1xf32> to vector<8x128xf32>
    %48 = arith.mulf %47, %0 : vector<8x128xf32>
    %49 = vector.broadcast %8 : vector<8x1xf32> to vector<8x128xf32>
    %50 = arith.mulf %49, %46 : vector<8x128xf32>
    %51 = arith.addf %48, %50 : vector<8x128xf32>
    %c0_27 = arith.constant 0 : index
    %c0_28 = arith.constant 0 : index
    %52 = vector.load %arg10[%c0_27, %c0_28] : memref<8x128xf32, #tpu.memory_space<vmem>>, vector<8x128xf32>
    tpu.vector_store %arg10[%c0_27, %c0_28], %51 {strides = array<i32>} : memref<8x128xf32, #tpu.memory_space<vmem>>, vector<8x128xf32>,
    return
  }
  func.func @transform_0(%arg0: i32) -> (i32, i32) {
    %c0_i32 = arith.constant 0 : i32
    %c0_i32_0 = arith.constant 0 : i32
    return %arg0, %c0_i32 : i32, i32
  }
  func.func @transform_1(%arg0: i32) -> (i32, i32) {
    %c0_i32 = arith.constant 0 : i32
    %c0_i32_0 = arith.constant 0 : i32
    return %arg0, %c0_i32 : i32, i32
  }
  func.func @transform_2(%arg0: i32) -> (i32, i32) {
    %c0_i32 = arith.constant 0 : i32
    %c0_i32_0 = arith.constant 0 : i32
    %c0_i32_1 = arith.constant 0 : i32
    return %c0_i32, %c0_i32_0 : i32, i32
  }
  func.func @transform_3(%arg0: i32) -> (i32, i32) {
    %c0_i32 = arith.constant 0 : i32
    %c0_i32_0 = arith.constant 0 : i32
    %c0_i32_1 = arith.constant 0 : i32
    return %c0_i32, %c0_i32_0 : i32, i32
  }
  func.func @transform_4(%arg0: i32) -> (i32, i32) {
    %c0_i32 = arith.constant 0 : i32
    %c0_i32_0 = arith.constant 0 : i32
    %c0_i32_1 = arith.constant 0 : i32
    return %c0_i32, %c0_i32_0 : i32, i32
  }
  func.func @transform_5(%arg0: i32) -> (i32, i32) {
    %c0_i32 = arith.constant 0 : i32
    %c0_i32_0 = arith.constant 0 : i32
    %c0_i32_1 = arith.constant 0 : i32
    return %c0_i32, %c0_i32_0 : i32, i32
  }
  func.func @transform_6(%arg0: i32) -> (i32, i32) {
    %c0_i32 = arith.constant 0 : i32
    %c0_i32_0 = arith.constant 0 : i32
    %c0_i32_1 = arith.constant 0 : i32
    return %c0_i32, %c0_i32_0 : i32, i32
  }
  func.func @transform_7(%arg0: i32) -> (i32, i32) {
    %c0_i32 = arith.constant 0 : i32
    %c0_i32_0 = arith.constant 0 : i32
    %c0_i32_1 = arith.constant 0 : i32
    return %c0_i32, %c0_i32_0 : i32, i32
  }
  func.func @transform_8(%arg0: i32) -> (i32, i32) {
    %c0_i32 = arith.constant 0 : i32
    %c0_i32_0 = arith.constant 0 : i32
    %c0_i32_1 = arith.constant 0 : i32
    return %c0_i32, %c0_i32_0 : i32, i32
  }
  func.func @transform_9(%arg0: i32) -> (i32, i32) {
    %c0_i32 = arith.constant 0 : i32
    %c0_i32_0 = arith.constant 0 : i32
    return %arg0, %c0_i32 : i32, i32
  }
}

</mosaic_0001>

<bundles_post_ra>
// kernel: tpu_custom_call.1
= control target key start
LH: loop header
LB: loop body
LE: loop exit
PB: predicated region body
PF: predicated region fallthrough
CT: control target
= control target key end

     0   :  { %14 = vsyncpa [#allocation3], 0  ;;  %s1306_s0 = inlined_call_operand.vmem [shape: f32[8,128], index: 0, kind: input, shape index: {}]   ;;  %s1307_s1 = inlined_call_operand.vmem [shape: f32[8,1], index: 1, kind: input, shape index: {}]   ;;  %s1308_s2 = inlined_call_operand.vmem [shape: f32[1,128], index: 2, kind: input, shape index: {}]   ;;  %s1309_s3 = inlined_call_operand.hbm [shape: f32[128,128], index: 3, kind: input, shape index: {}]   ;;  %s1310_s4 = inlined_call_operand.hbm [shape: f32[128,128], index: 4, kind: input, shape index: {}]   ;;  %s1311_s5 = inlined_call_operand.hbm [shape: f32[128,128], index: 5, kind: input, shape index: {}]   ;;  %s1312_s6 = inlined_call_operand.vmem [shape: f32[1,128], index: 6, kind: input, shape index: {}]   ;;  %s1313_s7 = inlined_call_operand.hbm [shape: f32[128,128], index: 7, kind: input, shape index: {}]   ;;  %s1314_s8 = inlined_call_operand.vmem [shape: f32[1,128], index: 8, kind: input, shape index: {}]   ;;  %s1315_s9 = inlined_call_operand.hbm [shape: f32[8,128], index: 9, kind: output, shape index: {}]  }
   0x1   :  { %15 = vsyncpa [#allocation6], 0 }
   0x2   :  { %16 = vsyncpa [#allocation9], 0 }
   0x3   :  { %17 = vsyncpa [#allocation4], 0  ;;  %s1085_s30 = smov [#allocation5]   ;;  %s1086_s11 = smov [#allocation2]  }
   0x4   :  { %s41_s10 = sshll.u32 %s1085_s30, 4  ;;  %s29_s12 = sshll.u32 %s1086_s11, 4  ;;  %s42_s10 = int_to_ptr.vmem [resolvable:$true] %s41_s10  ;;  %s30_s12 = int_to_ptr.vmem [resolvable:$true] %s29_s12 }
   0x5   :  { %s985_s13 = scalar_lea.vmem %s42_s10, 2048  ;;  %p990_p1 = scmp.lt.s32.totalorder %s42_s10, %s42_s10 }
   0x6   :  { %p986_p0 = scmp.ne.s32.totalorder %s42_s10, %s985_s13  ;;  %p991_p2 = scmp.lt.s32.totalorder %s985_s13, %s985_s13 }
   0x8   :  { %p992_p3 = por %p991_p2, %p990_p1 }
   0xa   :  { %p993_p4 = pnand %p992_p3, %p986_p0 }
   0xc   :  { %996 = shalt.err (!%p993_p4)
}
   0xd   :  { %s1087_s14 = smov 128   ;;  %s1088_s15 = smov 8  }
   0xe   :  { %47 = dma.hbm_to_vmem [thread:$0]  %s1310_s4, 2048, %s42_s10, [#allocation6], %s1087_s14, %s1087_s14, %s1088_s15  }
   0xf   :  { %s1005_s18 = scalar_lea.vmem %s30_s12, 2048  ;;  %p1010_p6 = scmp.lt.s32.totalorder %s30_s12, %s30_s12 }
  0x10   :  { %p1006_p5 = scmp.ne.s32.totalorder %s30_s12, %s1005_s18  ;;  %p1011_p7 = scmp.lt.s32.totalorder %s1005_s18, %s1005_s18 }
  0x12   :  { %p1012_p8 = por %p1011_p7, %p1010_p6 }
  0x14   :  { %p1013_p9 = pnand %p1012_p8, %p1006_p5 }
  0x16   :  { %1016 = shalt.err (!%p1013_p9)
}
  0x17   :  { %35 = dma.hbm_to_vmem [thread:$0]  %s1309_s3, 2048, %s30_s12, [#allocation3], %s1087_s14, %s1087_s14, %s1088_s15  }
  0x18   :  { %s1089_s21 = smov [#allocation7]   ;;  %s1090_s23 = smov [#allocation8]  }
  0x19   :  { %s53_s22 = sshll.u32 %s1089_s21, 4  ;;  %s67_s24 = sshll.u32 %s1090_s23, 4  ;;  %s54_s22 = int_to_ptr.vmem [resolvable:$true] %s53_s22  ;;  %s68_s24 = int_to_ptr.vmem [resolvable:$true] %s67_s24 }
  0x1a   :  { %s1025_s4 = scalar_lea.vmem %s54_s22, 2048  ;;  %p1030_p11 = scmp.lt.s32.totalorder %s54_s22, %s54_s22 }
  0x1b   :  { %p1026_p10 = scmp.ne.s32.totalorder %s54_s22, %s1025_s4  ;;  %p1031_p12 = scmp.lt.s32.totalorder %s1025_s4, %s1025_s4 }
  0x1d   :  { %p1032_p13 = por %p1031_p12, %p1030_p11 }
  0x1f   :  { %p1033_p0 = pnand %p1032_p13, %p1026_p10 }
  0x21   :  { %1036 = shalt.err (!%p1033_p0)
}
  0x22   :  { %59 = dma.hbm_to_vmem [thread:$0]  %s1311_s5, 2048, %s54_s22, [#allocation6], %s1087_s14, %s1087_s14, %s1088_s15  }
  0x23   :  { %s1045_s3 = scalar_lea.vmem %s68_s24, 2048  ;;  %p1050_p2 = scmp.lt.s32.totalorder %s68_s24, %s68_s24 }
  0x24   :  { %p1046_p1 = scmp.ne.s32.totalorder %s68_s24, %s1045_s3  ;;  %p1051_p3 = scmp.lt.s32.totalorder %s1045_s3, %s1045_s3 }
  0x26   :  { %p1052_p4 = por %p1051_p3, %p1050_p2 }
  0x28   :  { %p1053_p5 = pnand %p1052_p4, %p1046_p1 }
  0x2a   :  { %1056 = shalt.err (!%p1053_p5)
}
  0x2b   :  { %73 = dma.hbm_to_vmem [thread:$0]  %s1313_s7, 2048, %s68_s24, [#allocation9], %s1087_s14, %s1087_s14, %s1088_s15  }
  0x2c   :  { %1077 = dma.done.wait [#allocation3], 2048  }
  0x2d   :  { %1078 = vsyncadd [#allocation3], 4294965248 }
  0x2e   :  { %1079 = dma.done.wait [#allocation6], 4096  }
  0x2f   :  { %1080 = vsyncadd [#allocation6], 4294963200 }
  0x30   :  { %1081 = dma.done.wait [#allocation9], 2048  }
  0x31   :  { %1082 = vsyncadd [#allocation9], 4294965248  ;;  %v1091_v0 = vmov 0   ;;  %v1092_v1 = vmov 0.0   ;;  %v1180_v2 = vld [vmem:[%s1307_s1] sm:$0xff]  ;;  %v341_v3 = vld [vmem:[#allocation2 + $0x78] sm:$0xff] }
  0x32   :  { %963 = vset.pattern.permute.xlu0 %v1091_v0  ;;  %838 = vmatprep.subr.mxu1 %v1092_v1  ;;  %v340_v4 = vld [vmem:[#allocation2 + $0x70] sm:$0xff]  ;;  %965 = vlog2.f32 %v1180_v2  ;;  %v90_v5 = vmul.f32 %v1180_v2, %v1180_v2  ;;  %v339_v6 = vld [vmem:[#allocation2 + $0x68] sm:$0xff]  ;;  %v338_v8 = vld [vmem:[#allocation2 + $0x60] sm:$0xff]  ;;  %vm1093_vm0 = vmmov 0   ;;  %v1094_v57 = vmov 683565275  }
  0x33   :  { %803 = vmatprep.subr.mxu0 %v1092_v1  ;;  %964 = vset.pattern.permute.xlu1 %v1091_v0  ;;  %v337_v9 = vld [vmem:[#allocation2 + $0x58] sm:$0xff]  ;;  %v336_v10 = vld [vmem:[#allocation2 + $0x50] sm:$0xff]  ;;  %v335_v11 = vld [vmem:[#allocation2 + $0x48] sm:$0xff]  ;;  %v1095_v59 = vmov 2475754826  }
  0x34   :  { %839 = vmatpush3.msra.mxu1 %v341_v3  ;;  %v91_v7 = vadd.f32 0.25, %v90_v5  ;;  %v334_v12 = vld [vmem:[#allocation2 + $0x40] sm:$0xff]  ;;  %v333_v14 = vld [vmem:[#allocation2 + $0x38] sm:$0xff]  ;;  %v332_v16 = vld [vmem:[#allocation2 + $0x30] sm:$0xff]  ;;  %870 = vmatprep.mubr.msk.f32.mxu1 %vm1093_vm0, %v1092_v1  ;;  %v1096_v62 = vmov 2131351028  }
  0x35   :  { %840 = vmatprep.subr.mxu1 %v1092_v1  ;;  %v331_v18 = vld [vmem:[#allocation2 + $0x28] sm:$0xff]  ;;  %v330_v20 = vld [vmem:[#allocation2 + $0x20] sm:$0xff]  ;;  %v329_v21 = vld [vmem:[#allocation2 + $0x18] sm:$0xff]  ;;  %835 = vmatprep.mubr.msk.f32.mxu0 %vm1093_vm0, %v1092_v1  ;;  %v1097_v3 = vmov 2102212464  }
  0x36   :  { %841 = vmatpush3.msra.mxu1 %v340_v4  ;;  %967 = vrsqrt.f32 %v91_v7  ;;  %v328_v22 = vld [vmem:[#allocation2 + $0x10] sm:$0xff]  ;;  %v327_v23 = vld [vmem:[#allocation2 + $0x8] sm:$0xff]  ;;  %v326_v24 = vld [vmem:[#allocation2] sm:$0xff] }
  0x37   :  { %842 = vmatprep.subr.mxu1 %v1092_v1  ;;  %v357_v25 = vld [vmem:[#allocation5 + $0x78] sm:$0xff]  ;;  %v356_v26 = vld [vmem:[#allocation5 + $0x70] sm:$0xff]  ;;  %v355_v27 = vld [vmem:[#allocation5 + $0x68] sm:$0xff] }
  0x38   :  { %843 = vmatpush3.msra.mxu1 %v339_v6  ;;  %804 = vmatpush3.msra.mxu0 %v357_v25  ;;  %v354_v28 = vld [vmem:[#allocation5 + $0x60] sm:$0xff]  ;;  %v353_v29 = vld [vmem:[#allocation5 + $0x58] sm:$0xff]  ;;  %v352_v30 = vld [vmem:[#allocation5 + $0x50] sm:$0xff]  ;;  %v1098_v6 = vmov 920167782  }
  0x39   :  { %844 = vmatprep.subr.mxu1 %v1092_v1  ;;  %805 = vmatprep.subr.mxu0 %v1092_v1  ;;  %v351_v31 = vld [vmem:[#allocation5 + $0x48] sm:$0xff]  ;;  %v350_v32 = vld [vmem:[#allocation5 + $0x40] sm:$0xff]  ;;  %v349_v33 = vld [vmem:[#allocation5 + $0x38] sm:$0xff] }
  0x3a   :  { %845 = vmatpush3.msra.mxu1 %v338_v8  ;;  %806 = vmatpush3.msra.mxu0 %v356_v26  ;;  %v348_v34 = vld [vmem:[#allocation5 + $0x30] sm:$0xff]  ;;  %v347_v35 = vld [vmem:[#allocation5 + $0x28] sm:$0xff]  ;;  %v346_v36 = vld [vmem:[#allocation5 + $0x20] sm:$0xff] }
  0x3b   :  { %846 = vmatprep.subr.mxu1 %v1092_v1  ;;  %807 = vmatprep.subr.mxu0 %v1092_v1  ;;  %v345_v37 = vld [vmem:[#allocation5 + $0x18] sm:$0xff]  ;;  %v344_v38 = vld [vmem:[#allocation5 + $0x10] sm:$0xff]  ;;  %v343_v39 = vld [vmem:[#allocation5 + $0x8] sm:$0xff] }
  0x3c   :  { %847 = vmatpush3.msra.mxu1 %v337_v9  ;;  %808 = vmatpush3.msra.mxu0 %v355_v27  ;;  %v342_v40 = vld [vmem:[#allocation5] sm:$0xff]  ;;  %v1099_v9 = vmov 1326507024  }
  0x3d   :  { %848 = vmatprep.subr.mxu1 %v1092_v1  ;;  %809 = vmatprep.subr.mxu0 %v1092_v1  ;;  %v724_v41 = vld [vmem:[%s1308_s2] ss:$0 sm:$0xff] }
  0x3e   :  { %849 = vmatpush3.msra.mxu1 %v336_v10  ;;  %810 = vmatpush3.msra.mxu0 %v354_v28  ;;  %v1232_v44 = vld [vmem:[%s1306_s0] sm:$0xff] }
  0x3f   :  { %850 = vmatprep.subr.mxu1 %v1092_v1  ;;  %v966_v13 = vpop.eup %965  ;;  %811 = vmatprep.subr.mxu0 %v1092_v1 }
  0x40   :  { %851 = vmatpush3.msra.mxu1 %v335_v11  ;;  %v98_v15 = vmul.f32 0.6931472, %v966_v13  ;;  %812 = vmatpush3.msra.mxu0 %v353_v29 }
  0x41   :  { %852 = vmatprep.subr.mxu1 %v1092_v1  ;;  %813 = vmatprep.subr.mxu0 %v1092_v1 }
  0x42   :  { %853 = vmatpush3.msra.mxu1 %v334_v12  ;;  %v99_v17 = vmul.f32 0.25, %v98_v15  ;;  %814 = vmatpush3.msra.mxu0 %v352_v30 }
  0x43   :  { %854 = vmatprep.subr.mxu1 %v1092_v1  ;;  %v1194_v19 = vpop.eup %967  ;;  %815 = vmatprep.subr.mxu0 %v1092_v1 }
  0x44   :  { %855 = vmatpush3.msra.mxu1 %v333_v14  ;;  %109 = vperm.xlu0 %963, %v99_v17  }
  0x45   :  { %856 = vmatprep.subr.mxu1 %v1092_v1  ;;  %816 = vmatpush3.msra.mxu0 %v351_v31 }
  0x46   :  { %857 = vmatpush3.msra.mxu1 %v332_v16  ;;  %817 = vmatprep.subr.mxu0 %v1092_v1 }
  0x47   :  { %858 = vmatprep.subr.mxu1 %v1092_v1  ;;  %818 = vmatpush3.msra.mxu0 %v350_v32 }
  0x48   :  { %859 = vmatpush3.msra.mxu1 %v331_v18  ;;  %102 = vperm.xlu0 %963, %v1194_v19  }
  0x49   :  { %860 = vmatprep.subr.mxu1 %v1092_v1  ;;  %819 = vmatprep.subr.mxu0 %v1092_v1 }
  0x4a   :  { %861 = vmatpush3.msra.mxu1 %v330_v20  ;;  %820 = vmatpush3.msra.mxu0 %v349_v33 }
  0x4b   :  { %862 = vmatprep.subr.mxu1 %v1092_v1  ;;  %821 = vmatprep.subr.mxu0 %v1092_v1 }
  0x4c   :  { %863 = vmatpush3.msra.mxu1 %v329_v21  ;;  %822 = vmatpush3.msra.mxu0 %v348_v34 }
  0x4d   :  { %864 = vmatprep.subr.mxu1 %v1092_v1  ;;  %823 = vmatprep.subr.mxu0 %v1092_v1 }
  0x4e   :  { %865 = vmatpush3.msra.mxu1 %v328_v22  ;;  %824 = vmatpush3.msra.mxu0 %v347_v35 }
  0x4f   :  { %866 = vmatprep.subr.mxu1 %v1092_v1  ;;  %825 = vmatprep.subr.mxu0 %v1092_v1 }
  0x50   :  { %867 = vmatpush3.msra.mxu1 %v327_v23  ;;  %826 = vmatpush3.msra.mxu0 %v346_v36 }
  0x51   :  { %868 = vmatprep.subr.mxu1 %v1092_v1  ;;  %827 = vmatprep.subr.mxu0 %v1092_v1 }
  0x52   :  { %869 = vmatpush3.msra.mxu1 %v326_v24  ;;  %828 = vmatpush3.msra.mxu0 %v345_v37 }
  0x53   :  { %908 = vmatprep.subr.mxu1 %v1092_v1  ;;  %829 = vmatprep.subr.mxu0 %v1092_v1 }
  0x54   :  { %830 = vmatpush3.msra.mxu0 %v344_v38 }
  0x55   :  { %831 = vmatprep.subr.mxu0 %v1092_v1 }
  0x56   :  { %832 = vmatpush3.msra.mxu0 %v343_v39 }
  0x57   :  { %833 = vmatprep.subr.mxu0 %v1092_v1 }
  0x58   :  { %834 = vmatpush3.msra.mxu0 %v342_v40 }
  0x59   :  { %873 = vmatprep.subr.mxu0 %v1092_v1 }
  0xbf   :  { %v110_v42 = vpop.permute.xlu0 %109 }
  0xc0   :  { %v1227_v43 = vmul.f32 %v724_v41, %v110_v42 }
  0xc2   :  { %v122_v45 = vand.u32 2139095040, %v1227_v43  ;;  %v119_v51 = vand.u32 2147483647, %v1227_v43  ;;  %vm121_vm8 = vcmp.lt.s32.totalorder %v1227_v43, 0  ;;  %vm211_vm13 = vweird.f32 %v1227_v43 }
  0xc3   :  { %v103_v46 = vpop.permute.xlu0 %102 }
  0xc4   :  { %v123_v47 = vshrl.u32 %v122_v45, 23  ;;  %v105_v48 = vmul.f32 %v103_v46, %v1232_v44  ;;  %v126_v54 = vand.u32 8388607, %v119_v51  ;;  %vm120_vm9 = vcmp.le.f32.partialorder %v119_v51, 0.7853982 }
  0xc6   :  { %v725_v49 = vadd.s32 4294967169, %v123_v47  ;;  %871 = vmatmul.mubr.f32.vlgmr.msra.gmra.mxu1 %v105_v48  ;;  %v127_v11 = vor.u32 8388608, %v126_v54 }
  0xc7   :  { %940 = vmatprep.mubr.msk.f32.mxu1 %vm1093_vm0, %v1092_v1 }
  0xc8   :  { %v129_v50 = vadd.s32 1, %v725_v49  ;;  %v167_v26 = vshll.u32 %v127_v11, 8 }
  0xca   :  { %vm130_vm1 = vcmp.gt.s32.totalorder %v129_v50, 0 }
  0xcb   :  { %v131_v52 = vsel %vm130_vm1, %v129_v50, 0 }
  0xcc   :  { %v133_v53 = vand.u32 31, %v131_v52  ;;  %v132_v56 = vshrl.u32 %v131_v52, 5 }
  0xce   :  { %v134_v55 = vsub.s32 32, %v133_v53  ;;  %v136_v58 = vshll.u32 %v1094_v57, %v133_v53  ;;  %v139_v60 = vshll.u32 %v1095_v59, %v133_v53  ;;  %v142_v0 = vshll.u32 %v1096_v62, %v133_v53 }
  0xcf   :  { %v145_v5 = vshll.u32 %v1097_v3, %v133_v53  ;;  %v148_v8 = vshll.u32 %v1098_v6, %v133_v53  ;;  %vm151_vm2 = vcmp.lt.s32.totalorder %v132_v56, 1  ;;  %vm154_vm3 = vcmp.lt.s32.totalorder %v132_v56, 4 }
  0xd0   :  { %v137_v61 = vshrl.u32 %v1095_v59, %v134_v55  ;;  %v140_v63 = vshrl.u32 %v1096_v62, %v134_v55  ;;  %v143_v4 = vshrl.u32 %v1097_v3, %v134_v55  ;;  %v146_v7 = vshrl.u32 %v1098_v6, %v134_v55 }
  0xd1   :  { %v149_v10 = vshrl.u32 %v1099_v9, %v134_v55  ;;  %v135_v21 = vshrl.u32 %v1094_v57, %v134_v55  ;;  %vm153_vm4 = vcmp.lt.s32.totalorder %v132_v56, 3  ;;  %vm152_vm5 = vcmp.lt.s32.totalorder %v132_v56, 2 }
  0xd2   :  { %v138_v12 = vor.u32 %v137_v61, %v136_v58  ;;  %v141_v13 = vor.u32 %v140_v63, %v139_v60  ;;  %v144_v14 = vor.u32 %v143_v4, %v142_v0  ;;  %v147_v15 = vor.u32 %v146_v7, %v145_v5 }
  0xd3   :  { %v150_v16 = vor.u32 %v149_v10, %v148_v8 }
  0xd4   :  { %v156_v17 = vsel %vm154_vm3, %v144_v14, 2102212464  ;;  %v159_v18 = vsel %vm151_vm2, %v138_v12, %v141_v13  ;;  %v163_v20 = vsel %vm151_vm2, %v141_v13, %v144_v14  ;;  %v160_v22 = vsel %vm154_vm3, %v147_v15, 920167782 }
  0xd5   :  { %v164_v23 = vsel %vm154_vm3, %v150_v16, 1326507024  ;;  %v161_v24 = vsel %vm153_vm4, %v144_v14, %v160_v22  ;;  %v155_v27 = vsel %vm151_vm2, %v135_v21, %v138_v12  ;;  %v157_v28 = vsel %vm153_vm4, %v141_v13, %v156_v17  ;;  %v513_v16 = vld [vmem:[#allocation7 + $0x78] sm:$0xff]  ;;  %v510_v21 = vld [vmem:[#allocation7 + $0x60] sm:$0xff] }
  0xd6   :  { %v165_v25 = vsel %vm153_vm4, %v147_v15, %v164_v23  ;;  %v162_v29 = vsel %vm152_vm5, %v159_v18, %v161_v24  ;;  %v158_v35 = vsel %vm152_vm5, %v155_v27, %v157_v28  ;;  %v512_v18 = vld [vmem:[#allocation7 + $0x70] sm:$0xff]  ;;  %v509_v22 = vld [vmem:[#allocation7 + $0x58] sm:$0xff]  ;;  %v507_v24 = vld [vmem:[#allocation7 + $0x48] sm:$0xff] }
  0xd7   :  { %v166_v30 = vsel %vm152_vm5, %v163_v20, %v165_v25  ;;  %v1244_v33 = vmul.u32.u64.low %v167_v26, %v162_v29  ;;  %v1245_v34 = vmul.u32.u64.high %v167_v26, %v162_v29, %v1244_v33  ;;  %v174_v37 = vmul.u32 %v167_v26, %v158_v35  ;;  %v511_v20 = vld [vmem:[#allocation7 + $0x68] sm:$0xff]  ;;  %v508_v23 = vld [vmem:[#allocation7 + $0x50] sm:$0xff]  ;;  %v506_v25 = vld [vmem:[#allocation7 + $0x40] sm:$0xff] }
  0xd8   :  { %v1241_v31 = vmul.u32.u64.low %v167_v26, %v166_v30  ;;  %v1242_v32 = vmul.u32.u64.high %v167_v26, %v166_v30, %v1241_v31  ;;  %v505_v26 = vld [vmem:[#allocation7 + $0x38] sm:$0xff]  ;;  %v504_v27 = vld [vmem:[#allocation7 + $0x30] sm:$0xff]  ;;  %v503_v28 = vld [vmem:[#allocation7 + $0x28] sm:$0xff] }
  0xd9   :  { %v177_v36 = vadd.s32 1, %v1245_v34  ;;  %v502_v29 = vld [vmem:[#allocation7 + $0x20] sm:$0xff]  ;;  %v501_v31 = vld [vmem:[#allocation7 + $0x18] sm:$0xff]  ;;  %v499_v35 = vld [vmem:[#allocation7 + $0x8] sm:$0xff] }
  0xda   :  { %vm176_vm6 = vc.u32 %v1242_v32, %v1244_v33  ;;  %v175_v52 = vadd.s32 %v1244_v33, %v1242_v32  ;;  %v500_v32 = vld [vmem:[#allocation7 + $0x10] sm:$0xff] }
  0xdb   :  { %v178_v38 = vsel %vm176_vm6, %v177_v36, %v1245_v34  ;;  %v498_v36 = vld [vmem:[#allocation7] sm:$0xff] }
  0xdc   :  { %v179_v39 = vadd.s32 %v178_v38, %v174_v37 }
  0xde   :  { %v180_v40 = vadd.s32 536870912, %v179_v39 }
  0xe0   :  { %v181_v41 = vshrl.u32 %v180_v40, 30  ;;  %v614_v40 = vld [vmem:[#allocation8 + $0x70] sm:$0xff] }
  0xe2   :  { %v182_v42 = vshll.u32 %v181_v41, 30  ;;  %v205_v3 = vsub.s32 4, %v181_v41 }
  0xe4   :  { %v183_v45 = vsub.s32 %v179_v39, %v182_v42  ;;  %v206_v6 = vsel %vm121_vm8, %v205_v3, %v181_v41  ;;  %v615_v39 = vld [vmem:[#allocation8 + $0x78] sm:$0xff]  ;;  %v613_v41 = vld [vmem:[#allocation8 + $0x68] sm:$0xff] }
  0xe5   :  { %v208_v7 = vsel %vm120_vm9, 0, %v206_v6  ;;  %909 = vmatpush3.msra.mxu1 %v615_v39 }
  0xe6   :  { %v185_v46 = vsub.s32 0, %v183_v45  ;;  %v212_v8 = vadd.s32 3, %v208_v7  ;;  %v316_v30 = vand.u32 3, %v208_v7  ;;  %910 = vmatprep.subr.mxu1 %v1092_v1 }
  0xe7   :  { %911 = vmatpush3.msra.mxu1 %v614_v40 }
  0xe8   :  { %v726_v47 = vmin.u32 %v185_v46, %v183_v45  ;;  %v213_v9 = vand.u32 3, %v212_v8  ;;  %vm318_vm14 = vcmp.eq.s32.totalorder %v316_v30, 0  ;;  %vm321_vm15 = vcmp.eq.s32.totalorder %v316_v30, 2  ;;  %912 = vmatprep.subr.mxu1 %v1092_v1 }
  0xe9   :  { %913 = vmatpush3.msra.mxu1 %v613_v41 }
  0xea   :  { %v187_v48 = vclz %v726_v47  ;;  %vm218_vm10 = vcmp.eq.s32.totalorder %v213_v9, 2  ;;  %vm215_vm11 = vcmp.eq.s32.totalorder %v213_v9, 0  ;;  %vm214_vm12 = vcmp.lt.s32.totalorder %v213_v9, 2  ;;  %914 = vmatprep.subr.mxu1 %v1092_v1  ;;  %v610_v47 = vld [vmem:[#allocation8 + $0x50] sm:$0xff] }
  0xec   :  { %v727_v49 = vadd.s32 4294967294, %v187_v48  ;;  %v609_v48 = vld [vmem:[#allocation8 + $0x48] sm:$0xff] }
  0xee   :  { %vm728_vm7 = vcmp.lt.s32.totalorder %v727_v49, 0 }
  0xef   :  { %v190_v50 = vsel %vm728_vm7, 0, %v727_v49  ;;  %v608_v49 = vld [vmem:[#allocation8 + $0x40] sm:$0xff] }
  0xf0   :  { %v191_v53 = vsub.s32 32, %v190_v50  ;;  %v195_v54 = vsub.s32 4294967266, %v190_v50  ;;  %v192_v55 = vshll.u32 %v183_v45, %v190_v50  ;;  %v612_v45 = vld [vmem:[#allocation8 + $0x60] sm:$0xff]  ;;  %v607_v50 = vld [vmem:[#allocation8 + $0x38] sm:$0xff] }
  0xf1   :  { %915 = vmatpush3.msra.mxu1 %v612_v45 }
  0xf2   :  { %v193_v56 = vshrl.u32 %v175_v52, %v191_v53  ;;  %v196_v57 = vadd.s32 127, %v195_v54  ;;  %916 = vmatprep.subr.mxu1 %v1092_v1  ;;  %v606_v52 = vld [vmem:[#allocation8 + $0x30] sm:$0xff]  ;;  %v605_v53 = vld [vmem:[#allocation8 + $0x28] sm:$0xff]  ;;  %v604_v54 = vld [vmem:[#allocation8 + $0x20] sm:$0xff] }
  0xf4   :  { %v194_v58 = vor.u32 %v193_v56, %v192_v55  ;;  %v197_v59 = vshll.u32 %v196_v57, 23  ;;  %v603_v55 = vld [vmem:[#allocation8 + $0x18] sm:$0xff]  ;;  %v602_v56 = vld [vmem:[#allocation8 + $0x10] sm:$0xff]  ;;  %v601_v57 = vld [vmem:[#allocation8 + $0x8] sm:$0xff] }
  0xf6   :  { %v198_v60 = vor.u32 4788187, %v197_v59  ;;  %v201_v62 = vcvt.s32.f32 %v194_v58  ;;  %v600_v58 = vld [vmem:[#allocation8] sm:$0xff]  ;;  %v95_v59 = vmul.f32 %v1194_v19, %v1194_v19 }
  0xf8   :  { %v199_v61 = vand.u32 2147483647, %v198_v60  ;;  %v93_v60 = vmul.f32 0.5, %v1180_v2 }
  0xfa   :  { %v202_v63 = vmul.f32 %v201_v62, %v199_v61  ;;  %v96_v61 = vmul.f32 0.25, %v95_v59  ;;  %v94_v62 = vmul.f32 %v1194_v19, %v93_v60 }
  0xfc   :  { %v203_v0 = vxor.u32 2147483648, %v202_v63  ;;  %695 = vperm.xlu1 %964, %v96_v61  }
  0xfe   :  { %v204_v4 = vsel %vm121_vm8, %v203_v0, %v202_v63 }
  0xff   :  { %v207_v5 = vsel %vm120_vm9, %v1227_v43, %v204_v4  ;;  %v611_v43 = vld [vmem:[#allocation8 + $0x58] sm:$0xff] }
 0x100   :  { %969 = vcosq.f32 %v207_v5  ;;  %917 = vmatpush3.msra.mxu1 %v611_v43  ;;  %701 = vperm.xlu1 %964, %v94_v62  }
 0x101   :  { %971 = vsinq.f32 %v207_v5  ;;  %918 = vmatprep.subr.mxu1 %v1092_v1 }
 0x102   :  { %919 = vmatpush3.msra.mxu1 %v610_v47 }
 0x103   :  { %920 = vmatprep.subr.mxu1 %v1092_v1 }
 0x104   :  { %921 = vmatpush3.msra.mxu1 %v609_v48 }
 0x105   :  { %922 = vmatprep.subr.mxu1 %v1092_v1 }
 0x106   :  { %923 = vmatpush3.msra.mxu1 %v608_v49 }
 0x107   :  { %924 = vmatprep.subr.mxu1 %v1092_v1 }
 0x108   :  { %925 = vmatpush3.msra.mxu1 %v607_v50 }
 0x109   :  { %926 = vmatprep.subr.mxu1 %v1092_v1 }
 0x10a   :  { %927 = vmatpush3.msra.mxu1 %v606_v52 }
 0x10b   :  { %928 = vmatprep.subr.mxu1 %v1092_v1 }
 0x10c   :  { %929 = vmatpush3.msra.mxu1 %v605_v53 }
 0x10d   :  { %v970_v10 = vpop.eup %969  ;;  %930 = vmatprep.subr.mxu1 %v1092_v1 }
 0x10e   :  { %v972_v11 = vpop.eup %971  ;;  %v219_v12 = vxor.u32 2147483648, %v970_v10  ;;  %931 = vmatpush3.msra.mxu1 %v604_v54 }
 0x10f   :  { %v216_v13 = vxor.u32 2147483648, %v972_v11  ;;  %932 = vmatprep.subr.mxu1 %v1092_v1 }
 0x110   :  { %v220_v14 = vsel %vm218_vm10, %v219_v12, %v972_v11  ;;  %v323_v34 = vsel %vm321_vm15, %v219_v12, %v972_v11  ;;  %933 = vmatpush3.msra.mxu1 %v603_v55 }
 0x111   :  { %v217_v15 = vsel %vm215_vm11, %v970_v10, %v216_v13  ;;  %v320_v33 = vsel %vm318_vm14, %v970_v10, %v216_v13  ;;  %934 = vmatprep.subr.mxu1 %v1092_v1  ;;  %v734_v13 = vld [vmem:[%s1314_s8] ss:$0 sm:$0xff] }
 0x112   :  { %v221_v51 = vsel %vm214_vm12, %v217_v15, %v220_v14  ;;  %935 = vmatpush3.msra.mxu1 %v602_v56 }
 0x113   :  { %v222_v17 = vsel %vm211_vm13, nan, %v221_v51  ;;  %936 = vmatprep.subr.mxu1 %v1092_v1 }
 0x114   :  { %836 = vmatmul.mubr.f32.vlgmr.msra.gmra.mxu0 %v222_v17  ;;  %937 = vmatpush3.msra.mxu1 %v601_v57 }
 0x115   :  { %874 = vmatpush3.msra.mxu0 %v513_v16  ;;  %905 = vmatprep.mubr.msk.f32.mxu0 %vm1093_vm0, %v1092_v1  ;;  %vm317_vm0 = vcmp.lt.s32.totalorder %v316_v30, 2 }
 0x116   :  { %875 = vmatprep.subr.mxu0 %v1092_v1  ;;  %v324_v37 = vsel %vm317_vm0, %v320_v33, %v323_v34  ;;  %938 = vmatprep.subr.mxu1 %v1092_v1 }
 0x117   :  { %876 = vmatpush3.msra.mxu0 %v512_v18  ;;  %v325_v38 = vsel %vm211_vm13, nan, %v324_v37  ;;  %939 = vmatpush3.msra.mxu1 %v600_v58 }
 0x118   :  { %877 = vmatprep.subr.mxu0 %v1092_v1 }
 0x119   :  { %878 = vmatpush3.msra.mxu0 %v511_v20 }
 0x11a   :  { %879 = vmatprep.subr.mxu0 %v1092_v1 }
 0x11b   :  { %880 = vmatpush3.msra.mxu0 %v510_v21 }
 0x11c   :  { %881 = vmatprep.subr.mxu0 %v1092_v1 }
 0x11d   :  { %882 = vmatpush3.msra.mxu0 %v509_v22 }
 0x11e   :  { %883 = vmatprep.subr.mxu0 %v1092_v1 }
 0x11f   :  { %884 = vmatpush3.msra.mxu0 %v508_v23 }
 0x120   :  { %885 = vmatprep.subr.mxu0 %v1092_v1 }
 0x121   :  { %886 = vmatpush3.msra.mxu0 %v507_v24 }
 0x122   :  { %887 = vmatprep.subr.mxu0 %v1092_v1 }
 0x123   :  { %888 = vmatpush3.msra.mxu0 %v506_v25 }
 0x124   :  { %889 = vmatprep.subr.mxu0 %v1092_v1 }
 0x125   :  { %890 = vmatpush3.msra.mxu0 %v505_v26 }
 0x126   :  { %891 = vmatprep.subr.mxu0 %v1092_v1 }
 0x127   :  { %892 = vmatpush3.msra.mxu0 %v504_v27 }
 0x128   :  { %893 = vmatprep.subr.mxu0 %v1092_v1 }
 0x129   :  { %894 = vmatpush3.msra.mxu0 %v503_v28 }
 0x12a   :  { %895 = vmatprep.subr.mxu0 %v1092_v1 }
 0x12b   :  { %896 = vmatpush3.msra.mxu0 %v502_v29 }
 0x12c   :  { %897 = vmatprep.subr.mxu0 %v1092_v1 }
 0x12d   :  { %898 = vmatpush3.msra.mxu0 %v501_v31 }
 0x12e   :  { %899 = vmatprep.subr.mxu0 %v1092_v1 }
 0x12f   :  { %900 = vmatpush3.msra.mxu0 %v500_v32 }
 0x130   :  { %901 = vmatprep.subr.mxu0 %v1092_v1 }
 0x131   :  { %902 = vmatpush3.msra.mxu0 %v499_v35 }
 0x132   :  { %903 = vmatprep.subr.mxu0 %v1092_v1  ;;  %v733_v1 = vld [vmem:[%s1312_s6] ss:$0 sm:$0xff]  ;;  %s1100_s6 = smov [#allocation10]  }
 0x133   :  { %904 = vmatpush3.msra.mxu0 %v498_v36  ;;  %s713_s13 = sshll.u32 %s1100_s6, 4  ;;  %s714_s13 = int_to_ptr.vmem [resolvable:$true] %s713_s13 }
 0x134   :  { %906 = vmatmul.mubr.f32.vlgmr.msra.gmra.mxu0 %v325_v38  ;;  %s1057_s14 = scalar_lea.vmem %s714_s13, 128  ;;  %p1062_p7 = scmp.lt.s32.totalorder %s714_s13, %s714_s13 }
 0x135   :  { %p1058_p6 = scmp.ne.s32.totalorder %s714_s13, %s1057_s14  ;;  %p1063_p8 = scmp.lt.s32.totalorder %s1057_s14, %s1057_s14 }
 0x137   :  { %p1064_p9 = por %p1063_p8, %p1062_p7 }
 0x139   :  { %p1065_p10 = pnand %p1064_p9, %p1058_p6 }
 0x177   :  { %v696_v12 = vpop.permute.xlu1 %695 }
 0x178   :  { %v698_v17 = vmul.f32 %v696_v12, %v1232_v44 }
 0x17b   :  { %v702_v51 = vpop.permute.xlu1 %701 }
 0x186   :  { %v494_v42 = vpop.f32.mrf.mxu1 }
 0x188   :  { %v872_v46 = vpop.f32.mrf.mxu1 }
 0x1d4   :  { %v424_v63 = vpop.f32.mrf.mxu0 }
 0x1d5   :  { %v495_v3 = vadd.f32 %v494_v42, %v424_v63 }
 0x1d6   :  { %v837_v0 = vpop.f32.mrf.mxu0 }
 0x1f4   :  { %v580_v4 = vpop.f32.mrf.mxu0 }
 0x1f5   :  { %v584_v5 = vadd.f32 %v580_v4, %v495_v3 }
 0x1f6   :  { %v907_v6 = vpop.f32.mrf.mxu0 }
 0x1f7   :  { %v592_v7 = vadd.f32 %v733_v1, %v584_v5 }
 0x1f9   :  { %v593_v8 = vsub.f32 0.0, %v592_v7 }
 0x1fb   :  { %v594_v9 = vmul.f32 1.442695, %v593_v8 }
 0x1fd   :  { %973 = vpow2.f32 %v594_v9 }
 0x20a   :  { %v974_v2 = vpop.eup %973 }
 0x20b   :  { %v596_v10 = vadd.f32 1.0, %v974_v2 }
 0x20d   :  { %975 = vrcp.f32 %v596_v10 }
 0x21a   :  { %v976_v11 = vpop.eup %975 }
 0x21b   :  { %v599_v19 = vmul.f32 %v976_v11, %v592_v7 }
 0x21d   :  { %941 = vmatmul.mubr.f32.vlgmr.msra.gmra.mxu1 %v599_v19 }
 0x2dd   :  { %v689_v14 = vpop.f32.mrf.mxu1 }
 0x2de   :  { %v690_v15 = vadd.f32 %v734_v13, %v689_v14 }
 0x2df   :  { %v942_v16 = vpop.f32.mrf.mxu1 }
 0x2e0   :  { %v704_v18 = vmul.f32 %v702_v51, %v690_v15 }
 0x2e2   :  { %v705_v20 = vadd.f32 %v704_v18, %v698_v17 }
 0x2e4   :  { %706 = vst [vmem:[#allocation10] sm:$0xff] %v705_v20 }
 0x2e5   :  { %1068 = shalt.err (!%p1065_p10)
}
 0x2e6   :  { %716 = dma.vmem_to_hbm [thread:$0]  %s714_s13, 128, %s1315_s9, [#allocation4]  }
 0x2e7   :  { %1083 = dma.done.wait [#allocation4], 128  }
 0x2e8   :  { %1084 = vsyncadd [#allocation4], 4294967168 }
 0x2e9   :  { %720 = vsyncpa [#allocation3], 1 }
 0x2ea   :  { %721 = vsyncpa [#allocation6], 1 }
 0x2eb   :  { %722 = vsyncpa [#allocation9], 1 }
 0x2ec   :  { %723 = vsyncpa [#allocation4], 1 }

</bundles_post_ra>
